<compile_context>
chip_gen: v5e
topology: v5e:2x2
jax: 0.10.0
libtpu: 0.0.40
codegen_flags: <defaults>
</compile_context>

<pallas_src>
import jax
import jax.numpy as jnp
from jax.experimental import pallas as pl
from jax.experimental.pallas import tpu as pltpu


def _round_up(x, m):
    return (x + m - 1) // m * m


def _sublane(dtype):
    """Minimum second-minor tile multiple for a dtype (f32:8, bf16:16, int8:32)."""
    return max(8, 32 // jnp.dtype(dtype).itemsize)


def _pick_tm(B, sub, tm_cap):
    """Batch tile: multiple of `sub`, <= tm_cap; prefer >=2 batch tiles when B
    allows so the 'parallel' axis can shard across v7x's two TensorCores
    (no-op on single-TC v5e/v6e)."""
    tm = max(sub, min(tm_cap, _round_up(B, sub)))
    if B > sub and pl.cdiv(B, tm) < 2:
        tm = max(sub, _round_up(pl.cdiv(B, 2), sub))
    return tm


def _linear_kernel(x_ref, w_ref, b_ref, o_ref):
    # x_ref: (tm, F)  w_ref: (F, NUM_pad) resident  b_ref: (1, NUM_pad)
    # Whole-F tile: no accumulator, no init/finalize, lane-dense store.
    acc = jnp.dot(x_ref[...], w_ref[...], preferred_element_type=jnp.float32)
    o_ref[...] = (acc + b_ref[...]).astype(o_ref.dtype)


def _linear_reduce_kernel(x_ref, w_ref, b_ref, o_ref, acc_ref):
    # Fallback for very large F: (tm, tk) x (tk, NUM_pad) with f32 accumulator.
    k = pl.program_id(1)

    @pl.when(k == 0)
    def _():
        acc_ref[...] = jnp.zeros_like(acc_ref)

    acc_ref[...] += jnp.dot(x_ref[...], w_ref[...],
                            preferred_element_type=jnp.float32)

    @pl.when(k == pl.num_programs(1) - 1)
    def _():
        o_ref[...] = (acc_ref[...] + b_ref[...]).astype(o_ref.dtype)


def ssl_classifier_forward(x, weight, bias, *,
                           tm_max=256, tk_max=2048,
                           vmem_budget_bytes=20 << 20,
                           vmem_limit_bytes=40 << 20):
    """Forward of ssl_classifier: x.reshape(B, -1) @ weight.T + bias.

    x: (B, C, H, W); weight: (NUM, F) natural PyTorch layout; bias: (NUM,).
    """
    B = x.shape[0]
    x_flat = x.reshape(B, -1)            # glue: flatten in plain JAX (a reshape)
    F = x_flat.shape[1]
    NUM = weight.shape[0]

    x_itemsize = jnp.dtype(x_flat.dtype).itemsize
    w_itemsize = jnp.dtype(weight.dtype).itemsize
    sub = _sublane(x_flat.dtype)

    # Lane-dense output: pad NUM up to 128 and pre-transpose the weight so the
    # kernel contracts F against a (F, NUM_pad) RHS. Weight/bias/out are tiny
    # vs the x stream, so this padding cost is negligible.
    NUM_pad = _round_up(NUM, 128)
    w_t = jnp.zeros((F, NUM_pad), weight.dtype).at[:, :NUM].set(weight.T)
    b_pad = jnp.zeros((1, NUM_pad), jnp.float32).at[0, :NUM].set(
        bias.astype(jnp.float32))

    # ---------- Path 1: whole F in one tile (typical for this module) --------
    # Working set: x double-buffer + resident W^T (counted x2 conservatively)
    # + out double-buffer + bias.
    fixed = (2 * F * NUM_pad * w_itemsize
             + 2 * tm_max * NUM_pad * x_itemsize
             + 2 * NUM_pad * 4)
    tm_fit = 0
    if fixed < vmem_budget_bytes:
        tm_fit = (vmem_budget_bytes - fixed) // (2 * F * x_itemsize)
        tm_fit = (tm_fit // sub) * sub

    if tm_fit >= sub:
        tm = _pick_tm(B, sub, min(tm_max, int(tm_fit)))
        out = pl.pallas_call(
            _linear_kernel,
            out_shape=jax.ShapeDtypeStruct((B, NUM_pad), x.dtype),
            grid_spec=pltpu.PrefetchScalarGridSpec(
                num_scalar_prefetch=0,
                grid=(pl.cdiv(B, tm),),          # ragged last tile: masked store
                in_specs=[
                    pl.BlockSpec((tm, F), lambda i: (i, 0)),        # x stream
                    pl.BlockSpec((F, NUM_pad), lambda i: (0, 0)),   # resident W^T
                    pl.BlockSpec((1, NUM_pad), lambda i: (0, 0)),   # bias
                ],
                out_specs=pl.BlockSpec((tm, NUM_pad), lambda i: (i, 0)),
            ),
            compiler_params=pltpu.CompilerParams(
                dimension_semantics=("parallel",),
                vmem_limit_bytes=vmem_limit_bytes,
            ),
        )(x_flat, w_t, b_pad)
        return out[:, :NUM]

    # ---------- Path 2: F too large for one tile -> k-reduction --------------
    tm = _pick_tm(B, sub, tm_max)
    tk = min(tk_max, _round_up(F, 128))
    F_pad = _round_up(F, tk)
    if F_pad != F:
        # Explicit zero padding: never rely on OOB reads cancelling against
        # zeroed weight rows (garbage * 0 may be NaN).
        x_flat = jnp.pad(x_flat, ((0, 0), (0, F_pad - F)))
        w_t = jnp.pad(w_t, ((0, F_pad - F), (0, 0)))

    out = pl.pallas_call(
        _linear_reduce_kernel,
        out_shape=jax.ShapeDtypeStruct((B, NUM_pad), x.dtype),
        grid_spec=pltpu.PrefetchScalarGridSpec(
            num_scalar_prefetch=0,
            grid=(pl.cdiv(B, tm), F_pad // tk),   # reduction axis last
            in_specs=[
                pl.BlockSpec((tm, tk), lambda i, k: (i, k)),        # x tile
                pl.BlockSpec((tk, NUM_pad), lambda i, k: (k, 0)),   # W^T tile
                pl.BlockSpec((1, NUM_pad), lambda i, k: (0, 0)),    # bias
            ],
            out_specs=pl.BlockSpec((tm, NUM_pad), lambda i, k: (i, 0)),
            scratch_shapes=[pltpu.VMEM((tm, NUM_pad), jnp.float32)],
        ),
        compiler_params=pltpu.CompilerParams(
            dimension_semantics=("parallel", "arbitrary"),
            vmem_limit_bytes=vmem_limit_bytes,
        ),
    )(x_flat, w_t, b_pad)
    return out[:, :NUM]


if __name__ == "__main__":
    key = jax.random.PRNGKey(0)
    k_x, k_w, k_b = jax.random.split(key, 3)

    # Small shapes consistent with the module: x is (B, C, H, W); f = C*H*W.
    B, C, H, W = 2, 4, 16, 16
    F = C * H * W        # in_features
    NUM = 8              # out_features (num classes)

    x = jax.random.normal(k_x, (B, C, H, W), dtype=jnp.float32)
    # Deterministic synthetic params (PyTorch-like uniform init scale).
    bound = 1.0 / (F ** 0.5)
    weight = jax.random.uniform(k_w, (NUM, F), minval=-bound, maxval=bound,
                                dtype=jnp.float32)
    bias = jax.random.uniform(k_b, (NUM,), minval=-bound, maxval=bound,
                              dtype=jnp.float32)

    out = ssl_classifier_forward(x, weight, bias)
    out = jax.block_until_ready(out)

    # Sanity check against plain JAX reference.
    ref = x.reshape(B, -1) @ weight.T + bias
    assert out.shape == (B, NUM)
    assert jnp.allclose(out, ref, atol=1e-4, rtol=1e-4)

    print("KERNEL_OK")
</pallas_src>

<mosaic_0001>
module attributes {stable_mosaic.version = 11 : i64} {
  func.func @_linear_kernel(%arg0: i32, %arg1: memref<8x1024xf32, #tpu.memory_space<vmem>>, %arg2: memref<1024x128xf32, #tpu.memory_space<vmem>>, %arg3: memref<1x128xf32, #tpu.memory_space<vmem>>, %arg4: memref<8x128xf32, #tpu.memory_space<vmem>>) attributes {dimension_semantics = [#tpu.dimension_semantics<parallel>], iteration_bounds = array<i64: 1>, scalar_prefetch = 0 : i64, scratch_operands = 0 : i64, tpu.core_type = #tpu.core_type<tc>, window_params = [{transform_indices = @transform_0, window_bounds = array<i64: 8, 1024>}, {pipeline_mode = #tpu.pipeline_mode<synchronous>, transform_indices = @transform_1, window_bounds = array<i64: 1024, 128>}, {pipeline_mode = #tpu.pipeline_mode<synchronous>, transform_indices = @transform_2, window_bounds = array<i64: 1, 128>}, {transform_indices = @transform_3, window_bounds = array<i64: 8, 128>}]} {
    %c0 = arith.constant 0 : index
    %c0_0 = arith.constant 0 : index
    %0 = vector.load %arg1[%c0, %c0_0] : memref<8x1024xf32, #tpu.memory_space<vmem>>, vector<8x1024xf32>
    %c0_1 = arith.constant 0 : index
    %c0_2 = arith.constant 0 : index
    %1 = vector.load %arg2[%c0_1, %c0_2] : memref<1024x128xf32, #tpu.memory_space<vmem>>, vector<1024x128xf32>
    %cst = arith.constant dense<0.000000e+00> : vector<8x128xf32>
    %2 = tpu.matmul %0, %1, %cst {dimension_numbers = #tpu.dot_dimension_numbers<[1], [0], [0], [1], [0, 0, 1, 1], [], []>} : vector<8x1024xf32>, vector<1024x128xf32>, vector<8x128xf32> -> vector<8x128xf32>
    %c0_3 = arith.constant 0 : index
    %c0_4 = arith.constant 0 : index
    %3 = vector.load %arg3[%c0_3, %c0_4] : memref<1x128xf32, #tpu.memory_space<vmem>>, vector<1x128xf32>
    %4 = vector.broadcast %3 : vector<1x128xf32> to vector<8x128xf32>
    %5 = arith.addf %2, %4 : vector<8x128xf32>
    %c0_5 = arith.constant 0 : index
    %c0_6 = arith.constant 0 : index
    %6 = vector.load %arg4[%c0_5, %c0_6] : memref<8x128xf32, #tpu.memory_space<vmem>>, vector<8x128xf32>
    tpu.vector_store %arg4[%c0_5, %c0_6], %5 {strides = array<i32>} : memref<8x128xf32, #tpu.memory_space<vmem>>, vector<8x128xf32>,
    return
  }
  func.func @transform_0(%arg0: i32) -> (i32, i32) {
    %c0_i32 = arith.constant 0 : i32
    %c0_i32_0 = arith.constant 0 : i32
    return %arg0, %c0_i32 : i32, i32
  }
  func.func @transform_1(%arg0: i32) -> (i32, i32) {
    %c0_i32 = arith.constant 0 : i32
    %c0_i32_0 = arith.constant 0 : i32
    %c0_i32_1 = arith.constant 0 : i32
    return %c0_i32, %c0_i32_0 : i32, i32
  }
  func.func @transform_2(%arg0: i32) -> (i32, i32) {
    %c0_i32 = arith.constant 0 : i32
    %c0_i32_0 = arith.constant 0 : i32
    %c0_i32_1 = arith.constant 0 : i32
    return %c0_i32, %c0_i32_0 : i32, i32
  }
  func.func @transform_3(%arg0: i32) -> (i32, i32) {
    %c0_i32 = arith.constant 0 : i32
    %c0_i32_0 = arith.constant 0 : i32
    return %arg0, %c0_i32 : i32, i32
  }
}

</mosaic_0001>

<bundles_post_ra>
// kernel: tpu_custom_call.1
= control target key start
LH: loop header
LB: loop body
LE: loop exit
PB: predicated region body
PF: predicated region fallthrough
CT: control target
= control target key end

     0   :  { %8 = vsyncpa [#allocation3], 0  ;;  %s536_s0 = inlined_call_operand.hbm [shape: f32[2,1024], index: 0, kind: input, shape index: {}]   ;;  %s537_s1 = inlined_call_operand.hbm [shape: f32[1024,128], index: 1, kind: input, shape index: {}]   ;;  %s538_s2 = inlined_call_operand.vmem [shape: f32[1,128], index: 2, kind: input, shape index: {}]   ;;  %s539_s3 = inlined_call_operand.hbm [shape: f32[2,128], index: 3, kind: output, shape index: {}]  }
   0x1   :  { %9 = vsyncpa [#allocation6], 0 }
   0x2   :  { %10 = vsyncpa [#allocation4], 0 }
   0x3   :  { %14 = vsyncadd [#allocation3], 768  ;;  %s15_s14 = sshll.u32 %s536_s0, 4  ;;  %s495_s15 = smov [#allocation2]   ;;  %s16_s14 = int_to_ptr.hbm [resolvable:$true] %s15_s14 }
   0x4   :  { %s17_s16 = sshll.u32 %s495_s15, 4  ;;  %s28_s19 = sshll.u32 %s537_s1, 4  ;;  %s18_s16 = int_to_ptr.vmem [resolvable:$true] %s17_s16  ;;  %s29_s19 = int_to_ptr.hbm [resolvable:$true] %s28_s19 }
   0x5   :  { %s496_s20 = smov 256   ;;  %s497_s21 = smov 16  }
   0x6   :  { %23 = dma.hbm_to_vmem [thread:$0]  %s16_s14, 256, %s18_s16, [#allocation3], %s496_s20, %s496_s20, %s497_s21  }
   0x7   :  { %s498_s22 = smov [#allocation5]   ;;  %s499_s24 = smov 128  }
   0x8   :  { %s30_s23 = sshll.u32 %s498_s22, 4  ;;  %s500_s25 = smov 8   ;;  %s31_s23 = int_to_ptr.vmem [resolvable:$true] %s30_s23 }
   0x9   :  { %36 = dma.hbm_to_vmem [thread:$0]  %s29_s19, 16384, %s31_s23, [#allocation6], %s499_s24, %s499_s24, %s500_s25  }
   0xa   :  { %489 = dma.done.wait [#allocation3], 1024  }
   0xb   :  { %490 = vsyncadd [#allocation3], 4294966272 }
   0xc   :  { %491 = dma.done.wait [#allocation6], 16384  }
   0xd   :  { %492 = vsyncadd [#allocation6], 4294950912  ;;  %v102_v0 = vld [vmem:[#allocation5 + $0x178] sm:$0xff]  ;;  %v101_v2 = vld [vmem:[#allocation5 + $0x170] sm:$0xff] }
   0xe   :  { %v70_v1 = vld [vmem:[#allocation5 + $0x78] sm:$0xff]  ;;  %266 = vmatpush.msra.mxu2 %v102_v0  ;;  %v69_v4 = vld [vmem:[#allocation5 + $0x70] sm:$0xff]  ;;  %v100_v6 = vld [vmem:[#allocation5 + $0x168] sm:$0xff] }
   0xf   :  { %226 = vmatpush.msra.mxu0 %v70_v1  ;;  %v118_v3 = vld [vmem:[#allocation5 + $0x1f8] sm:$0xff]  ;;  %v117_v7 = vld [vmem:[#allocation5 + $0x1f0] sm:$0xff]  ;;  %v68_v8 = vld [vmem:[#allocation5 + $0x68] sm:$0xff] }
  0x10   :  { %v86_v5 = vld [vmem:[#allocation5 + $0xf8] sm:$0xff]  ;;  %286 = vmatpush.msra.mxu3 %v118_v3  ;;  %267 = vmatpush.msra.mxu2 %v101_v2  ;;  %v85_v9 = vld [vmem:[#allocation5 + $0xf0] sm:$0xff]  ;;  %v116_v10 = vld [vmem:[#allocation5 + $0x1e8] sm:$0xff] }
  0x11   :  { %246 = vmatpush.msra.mxu1 %v86_v5  ;;  %227 = vmatpush.msra.mxu0 %v69_v4  ;;  %v99_v11 = vld [vmem:[#allocation5 + $0x160] sm:$0xff]  ;;  %v84_v13 = vld [vmem:[#allocation5 + $0xe8] sm:$0xff]  ;;  %v98_v16 = vld [vmem:[#allocation5 + $0x158] sm:$0xff] }
  0x12   :  { %287 = vmatpush.msra.mxu3 %v117_v7  ;;  %v67_v12 = vld [vmem:[#allocation5 + $0x60] sm:$0xff]  ;;  %268 = vmatpush.msra.mxu2 %v100_v6  ;;  %v66_v17 = vld [vmem:[#allocation5 + $0x58] sm:$0xff]  ;;  %v97_v20 = vld [vmem:[#allocation5 + $0x150] sm:$0xff] }
  0x13   :  { %247 = vmatpush.msra.mxu1 %v85_v9  ;;  %228 = vmatpush.msra.mxu0 %v68_v8  ;;  %v115_v14 = vld [vmem:[#allocation5 + $0x1e0] sm:$0xff]  ;;  %v114_v18 = vld [vmem:[#allocation5 + $0x1d8] sm:$0xff]  ;;  %v65_v21 = vld [vmem:[#allocation5 + $0x50] sm:$0xff] }
  0x14   :  { %v83_v15 = vld [vmem:[#allocation5 + $0xe0] sm:$0xff]  ;;  %288 = vmatpush.msra.mxu3 %v116_v10  ;;  %269 = vmatpush.msra.mxu2 %v99_v11  ;;  %v82_v19 = vld [vmem:[#allocation5 + $0xd8] sm:$0xff]  ;;  %v113_v22 = vld [vmem:[#allocation5 + $0x1d0] sm:$0xff] }
  0x15   :  { %248 = vmatpush.msra.mxu1 %v84_v13  ;;  %229 = vmatpush.msra.mxu0 %v67_v12  ;;  %v81_v23 = vld [vmem:[#allocation5 + $0xd0] sm:$0xff]  ;;  %v96_v24 = vld [vmem:[#allocation5 + $0x148] sm:$0xff]  ;;  %v95_v28 = vld [vmem:[#allocation5 + $0x140] sm:$0xff] }
  0x16   :  { %289 = vmatpush.msra.mxu3 %v115_v14  ;;  %270 = vmatpush.msra.mxu2 %v98_v16  ;;  %v64_v25 = vld [vmem:[#allocation5 + $0x48] sm:$0xff]  ;;  %v63_v29 = vld [vmem:[#allocation5 + $0x40] sm:$0xff]  ;;  %v94_v32 = vld [vmem:[#allocation5 + $0x138] sm:$0xff] }
  0x17   :  { %249 = vmatpush.msra.mxu1 %v83_v15  ;;  %230 = vmatpush.msra.mxu0 %v66_v17  ;;  %v112_v26 = vld [vmem:[#allocation5 + $0x1c8] sm:$0xff]  ;;  %v111_v30 = vld [vmem:[#allocation5 + $0x1c0] sm:$0xff]  ;;  %v62_v33 = vld [vmem:[#allocation5 + $0x38] sm:$0xff] }
  0x18   :  { %290 = vmatpush.msra.mxu3 %v114_v18  ;;  %271 = vmatpush.msra.mxu2 %v97_v20  ;;  %v80_v27 = vld [vmem:[#allocation5 + $0xc8] sm:$0xff]  ;;  %v79_v31 = vld [vmem:[#allocation5 + $0xc0] sm:$0xff]  ;;  %v110_v34 = vld [vmem:[#allocation5 + $0x1b8] sm:$0xff] }
  0x19   :  { %250 = vmatpush.msra.mxu1 %v82_v19  ;;  %231 = vmatpush.msra.mxu0 %v65_v21  ;;  %v78_v35 = vld [vmem:[#allocation5 + $0xb8] sm:$0xff]  ;;  %v93_v36 = vld [vmem:[#allocation5 + $0x130] sm:$0xff]  ;;  %v92_v40 = vld [vmem:[#allocation5 + $0x128] sm:$0xff] }
  0x1a   :  { %291 = vmatpush.msra.mxu3 %v113_v22  ;;  %272 = vmatpush.msra.mxu2 %v96_v24  ;;  %v61_v37 = vld [vmem:[#allocation5 + $0x30] sm:$0xff]  ;;  %v60_v41 = vld [vmem:[#allocation5 + $0x28] sm:$0xff]  ;;  %v91_v44 = vld [vmem:[#allocation5 + $0x120] sm:$0xff] }
  0x1b   :  { %251 = vmatpush.msra.mxu1 %v81_v23  ;;  %232 = vmatpush.msra.mxu0 %v64_v25  ;;  %v109_v38 = vld [vmem:[#allocation5 + $0x1b0] sm:$0xff]  ;;  %v108_v42 = vld [vmem:[#allocation5 + $0x1a8] sm:$0xff]  ;;  %v59_v45 = vld [vmem:[#allocation5 + $0x20] sm:$0xff] }
  0x1c   :  { %292 = vmatpush.msra.mxu3 %v112_v26  ;;  %273 = vmatpush.msra.mxu2 %v95_v28  ;;  %v77_v39 = vld [vmem:[#allocation5 + $0xb0] sm:$0xff]  ;;  %v76_v43 = vld [vmem:[#allocation5 + $0xa8] sm:$0xff]  ;;  %v107_v46 = vld [vmem:[#allocation5 + $0x1a0] sm:$0xff] }
  0x1d   :  { %252 = vmatpush.msra.mxu1 %v80_v27  ;;  %233 = vmatpush.msra.mxu0 %v63_v29  ;;  %v75_v47 = vld [vmem:[#allocation5 + $0xa0] sm:$0xff]  ;;  %v90_v48 = vld [vmem:[#allocation5 + $0x118] sm:$0xff]  ;;  %v89_v52 = vld [vmem:[#allocation5 + $0x110] sm:$0xff] }
  0x1e   :  { %293 = vmatpush.msra.mxu3 %v111_v30  ;;  %274 = vmatpush.msra.mxu2 %v94_v32  ;;  %v58_v49 = vld [vmem:[#allocation5 + $0x18] sm:$0xff]  ;;  %v57_v53 = vld [vmem:[#allocation5 + $0x10] sm:$0xff]  ;;  %v88_v56 = vld [vmem:[#allocation5 + $0x108] sm:$0xff] }
  0x1f   :  { %253 = vmatpush.msra.mxu1 %v79_v31  ;;  %234 = vmatpush.msra.mxu0 %v62_v33  ;;  %v106_v50 = vld [vmem:[#allocation5 + $0x198] sm:$0xff]  ;;  %v105_v54 = vld [vmem:[#allocation5 + $0x190] sm:$0xff]  ;;  %v56_v57 = vld [vmem:[#allocation5 + $0x8] sm:$0xff] }
  0x20   :  { %294 = vmatpush.msra.mxu3 %v110_v34  ;;  %275 = vmatpush.msra.mxu2 %v93_v36  ;;  %v74_v51 = vld [vmem:[#allocation5 + $0x98] sm:$0xff]  ;;  %v73_v55 = vld [vmem:[#allocation5 + $0x90] sm:$0xff]  ;;  %v104_v58 = vld [vmem:[#allocation5 + $0x188] sm:$0xff] }
  0x21   :  { %254 = vmatpush.msra.mxu1 %v78_v35  ;;  %235 = vmatpush.msra.mxu0 %v61_v37  ;;  %v72_v59 = vld [vmem:[#allocation5 + $0x88] sm:$0xff]  ;;  %v87_v60 = vld [vmem:[#allocation5 + $0x100] sm:$0xff]  ;;  %v166_v62 = vld [vmem:[#allocation5 + $0x378] sm:$0xff] }
  0x22   :  { %295 = vmatpush.msra.mxu3 %v109_v38  ;;  %276 = vmatpush.msra.mxu2 %v92_v40  ;;  %v55_v61 = vld [vmem:[#allocation5] sm:$0xff]  ;;  %v134_v0 = vld [vmem:[#allocation5 + $0x278] sm:$0xff]  ;;  %v165_v2 = vld [vmem:[#allocation5 + $0x370] sm:$0xff] }
  0x23   :  { %255 = vmatpush.msra.mxu1 %v77_v39  ;;  %236 = vmatpush.msra.mxu0 %v60_v41  ;;  %v103_v63 = vld [vmem:[#allocation5 + $0x180] sm:$0xff]  ;;  %v182_v1 = vld [vmem:[#allocation5 + $0x3f8] sm:$0xff]  ;;  %v133_v4 = vld [vmem:[#allocation5 + $0x270] sm:$0xff] }
  0x24   :  { %296 = vmatpush.msra.mxu3 %v108_v42  ;;  %277 = vmatpush.msra.mxu2 %v91_v44  ;;  %v71_v3 = vld [vmem:[#allocation5 + $0x80] sm:$0xff]  ;;  %v150_v5 = vld [vmem:[#allocation5 + $0x2f8] sm:$0xff]  ;;  %v164_v6 = vld [vmem:[#allocation5 + $0x368] sm:$0xff] }
  0x25   :  { %256 = vmatpush.msra.mxu1 %v76_v43  ;;  %237 = vmatpush.msra.mxu0 %v59_v45  ;;  %v181_v7 = vld [vmem:[#allocation5 + $0x3f0] sm:$0xff]  ;;  %v132_v8 = vld [vmem:[#allocation5 + $0x268] sm:$0xff]  ;;  %v163_v10 = vld [vmem:[#allocation5 + $0x360] sm:$0xff] }
  0x26   :  { %297 = vmatpush.msra.mxu3 %v107_v46  ;;  %278 = vmatpush.msra.mxu2 %v90_v48  ;;  %v149_v9 = vld [vmem:[#allocation5 + $0x2f0] sm:$0xff]  ;;  %v180_v11 = vld [vmem:[#allocation5 + $0x3e8] sm:$0xff]  ;;  %v131_v12 = vld [vmem:[#allocation5 + $0x260] sm:$0xff] }
  0x27   :  { %257 = vmatpush.msra.mxu1 %v75_v47  ;;  %238 = vmatpush.msra.mxu0 %v58_v49  ;;  %v148_v13 = vld [vmem:[#allocation5 + $0x2e8] sm:$0xff]  ;;  %v47_v14 = vld [vmem:[#allocation2] sm:$0xff]  ;;  %v49_v15 = vld [vmem:[#allocation2 + $0x10] sm:$0xff] }
  0x28   :  { %298 = vmatpush.msra.mxu3 %v106_v50  ;;  %279 = vmatpush.msra.mxu2 %v89_v52  ;;  %v51_v16 = vld [vmem:[#allocation2 + $0x20] sm:$0xff]  ;;  %v162_v17 = vld [vmem:[#allocation5 + $0x358] sm:$0xff]  ;;  %v53_v19 = vld [vmem:[#allocation2 + $0x30] sm:$0xff]  ;;  %195 = vst [vmem:[#allocation1] ss:$4 sm:$0xff] %v47_v14 }
  0x29   :  { %258 = vmatpush.msra.mxu1 %v74_v51  ;;  %239 = vmatpush.msra.mxu0 %v57_v53  ;;  %v179_v18 = vld [vmem:[#allocation5 + $0x3e0] sm:$0xff]  ;;  %v130_v20 = vld [vmem:[#allocation5 + $0x258] sm:$0xff]  ;;  %197 = vst [vmem:[#allocation1 + $0x1] ss:$4 sm:$0xff] %v49_v15  ;;  %v161_v22 = vld [vmem:[#allocation5 + $0x350] sm:$0xff] }
  0x2a   :  { %299 = vmatpush.msra.mxu3 %v105_v54  ;;  %280 = vmatpush.msra.mxu2 %v88_v56  ;;  %v147_v21 = vld [vmem:[#allocation5 + $0x2e0] sm:$0xff]  ;;  %v178_v23 = vld [vmem:[#allocation5 + $0x3d8] sm:$0xff]  ;;  %199 = vst [vmem:[#allocation1 + $0x2] ss:$4 sm:$0xff] %v51_v16  ;;  %v129_v24 = vld [vmem:[#allocation5 + $0x250] sm:$0xff] }
  0x2b   :  { %259 = vmatpush.msra.mxu1 %v73_v55  ;;  %240 = vmatpush.msra.mxu0 %v56_v57  ;;  %v146_v25 = vld [vmem:[#allocation5 + $0x2d8] sm:$0xff]  ;;  %v160_v26 = vld [vmem:[#allocation5 + $0x348] sm:$0xff]  ;;  %201 = vst [vmem:[#allocation1 + $0x3] ss:$4 sm:$0xff] %v53_v19  ;;  %v177_v27 = vld [vmem:[#allocation5 + $0x3d0] sm:$0xff] }
  0x2c   :  { %300 = vmatpush.msra.mxu3 %v104_v58  ;;  %281 = vmatpush.msra.mxu2 %v87_v60  ;;  %v128_v28 = vld [vmem:[#allocation5 + $0x248] sm:$0xff]  ;;  %v145_v29 = vld [vmem:[#allocation5 + $0x2d0] sm:$0xff]  ;;  %v159_v30 = vld [vmem:[#allocation5 + $0x340] sm:$0xff] }
  0x2d   :  { %260 = vmatpush.msra.mxu1 %v72_v59  ;;  %241 = vmatpush.msra.mxu0 %v55_v61  ;;  %v176_v31 = vld [vmem:[#allocation5 + $0x3c8] sm:$0xff]  ;;  %v50_v33 = vld [vmem:[#allocation2 + $0x18] sm:$0xff]  ;;  %v127_v36 = vld [vmem:[#allocation5 + $0x240] sm:$0xff] }
  0x2e   :  { %346 = vmatpush.msrb.mxu2 %v166_v62  ;;  %301 = vmatpush.msra.mxu3 %v103_v63  ;;  %v48_v32 = vld [vmem:[#allocation2 + $0x8] sm:$0xff]  ;;  %v54_v35 = vld [vmem:[#allocation2 + $0x38] sm:$0xff]  ;;  %205 = vst [vmem:[#allocation1 + $0x21] ss:$4 sm:$0xff] %v50_v33  ;;  %v175_v39 = vld [vmem:[#allocation5 + $0x3c0] sm:$0xff] }
  0x2f   :  { %306 = vmatpush.msrb.mxu0 %v134_v0  ;;  %261 = vmatpush.msra.mxu1 %v71_v3  ;;  %v52_v34 = vld [vmem:[#allocation2 + $0x28] sm:$0xff]  ;;  %203 = vst [vmem:[#allocation1 + $0x20] ss:$4 sm:$0xff] %v48_v32  ;;  %v158_v38 = vld [vmem:[#allocation5 + $0x338] sm:$0xff]  ;;  %v143_v41 = vld [vmem:[#allocation5 + $0x2c0] sm:$0xff] }
  0x30   :  { %366 = vmatpush.msrb.mxu3 %v182_v1  ;;  %347 = vmatpush.msrb.mxu2 %v165_v2  ;;  %v144_v37 = vld [vmem:[#allocation5 + $0x2c8] sm:$0xff]  ;;  %207 = vst [vmem:[#allocation1 + $0x22] ss:$4 sm:$0xff] %v52_v34  ;;  %v126_v40 = vld [vmem:[#allocation5 + $0x238] sm:$0xff]  ;;  %v157_v42 = vld [vmem:[#allocation5 + $0x330] sm:$0xff] }
  0x31   :  { %307 = vmatpush.msrb.mxu0 %v133_v4  ;;  %326 = vmatpush.msrb.mxu1 %v150_v5  ;;  %209 = vst [vmem:[#allocation1 + $0x23] ss:$4 sm:$0xff] %v54_v35  ;;  %v174_v43 = vld [vmem:[#allocation5 + $0x3b8] sm:$0xff]  ;;  %v125_v44 = vld [vmem:[#allocation5 + $0x230] sm:$0xff]  ;;  %v156_v46 = vld [vmem:[#allocation5 + $0x328] sm:$0xff] }
  0x32   :  { %348 = vmatpush.msrb.mxu2 %v164_v6  ;;  %367 = vmatpush.msrb.mxu3 %v181_v7  ;;  %v142_v45 = vld [vmem:[#allocation5 + $0x2b8] sm:$0xff]  ;;  %v173_v47 = vld [vmem:[#allocation5 + $0x3b0] sm:$0xff]  ;;  %v124_v48 = vld [vmem:[#allocation5 + $0x228] sm:$0xff] }
  0x33   :  { %308 = vmatpush.msrb.mxu0 %v132_v8  ;;  %327 = vmatpush.msrb.mxu1 %v149_v9  ;;  %v141_v49 = vld [vmem:[#allocation5 + $0x2b0] sm:$0xff]  ;;  %v155_v50 = vld [vmem:[#allocation5 + $0x320] sm:$0xff]  ;;  %v172_v51 = vld [vmem:[#allocation5 + $0x3a8] sm:$0xff] }
  0x34   :  { %349 = vmatpush.msrb.mxu2 %v163_v10  ;;  %368 = vmatpush.msrb.mxu3 %v180_v11  ;;  %v212_v52 = vld.sshfl [vmem:[#allocation1 + $0x10] sm:$0xff pattern:$0x73625140]  ;;  %v123_v53 = vld [vmem:[#allocation5 + $0x220] sm:$0xff]  ;;  %v154_v55 = vld [vmem:[#allocation5 + $0x318] sm:$0xff] }
  0x35   :  { %309 = vmatpush.msrb.mxu0 %v131_v12  ;;  %328 = vmatpush.msrb.mxu1 %v148_v13  ;;  %v140_v54 = vld [vmem:[#allocation5 + $0x2a8] sm:$0xff]  ;;  %v171_v56 = vld [vmem:[#allocation5 + $0x3a0] sm:$0xff]  ;;  %v210_v57 = vld.sshfl [vmem:[#allocation1] sm:$0xff pattern:$0x73625140] }
  0x36   :  { %350 = vmatpush.msrb.mxu2 %v162_v17  ;;  %369 = vmatpush.msrb.mxu3 %v179_v18  ;;  %v213_v58 = vld.sshfl [vmem:[#allocation1 + $0x18] sm:$0xff pattern:$0x73625140]  ;;  %v122_v59 = vld [vmem:[#allocation5 + $0x218] sm:$0xff]  ;;  %v139_v60 = vld [vmem:[#allocation5 + $0x2a0] sm:$0xff] }
  0x37   :  { %310 = vmatpush.msrb.mxu0 %v130_v20  ;;  %329 = vmatpush.msrb.mxu1 %v147_v21  ;;  %v153_v61 = vld [vmem:[#allocation5 + $0x310] sm:$0xff]  ;;  %v170_v62 = vld [vmem:[#allocation5 + $0x398] sm:$0xff]  ;;  %v211_v63 = vld.sshfl [vmem:[#allocation1 + $0x8] sm:$0xff pattern:$0x73625140] }
  0x38   :  { %351 = vmatpush.msrb.mxu2 %v161_v22  ;;  %370 = vmatpush.msrb.mxu3 %v178_v23  ;;  %v121_v0 = vld [vmem:[#allocation5 + $0x210] sm:$0xff]  ;;  %v138_v1 = vld [vmem:[#allocation5 + $0x298] sm:$0xff]  ;;  %v152_v2 = vld [vmem:[#allocation5 + $0x308] sm:$0xff] }
  0x39   :  { %311 = vmatpush.msrb.mxu0 %v129_v24  ;;  %330 = vmatpush.msrb.mxu1 %v146_v25  ;;  %v169_v3 = vld [vmem:[#allocation5 + $0x390] sm:$0xff]  ;;  %v120_v4 = vld [vmem:[#allocation5 + $0x208] sm:$0xff]  ;;  %v151_v6 = vld [vmem:[#allocation5 + $0x300] sm:$0xff] }
  0x3a   :  { %352 = vmatpush.msrb.mxu2 %v160_v26  ;;  %371 = vmatpush.msrb.mxu3 %v177_v27  ;;  %v137_v5 = vld [vmem:[#allocation5 + $0x290] sm:$0xff]  ;;  %v168_v7 = vld [vmem:[#allocation5 + $0x388] sm:$0xff]  ;;  %v119_v9 = vld [vmem:[#allocation5 + $0x200] sm:$0xff] }
  0x3b   :  { %312 = vmatpush.msrb.mxu0 %v128_v28  ;;  %331 = vmatpush.msrb.mxu1 %v145_v29  ;;  %v216_v8 = vld.sshfl [vmem:[#allocation1 + $0x30] sm:$0xff pattern:$0x73625140]  ;;  %v167_v11 = vld [vmem:[#allocation5 + $0x380] sm:$0xff]  ;;  %v416_v16 = vld [vmem:[%s538_s2] ss:$0 sm:$0xff] }
  0x3c   :  { %353 = vmatpush.msrb.mxu2 %v159_v30  ;;  %372 = vmatpush.msrb.mxu3 %v176_v31  ;;  %v136_v10 = vld [vmem:[#allocation5 + $0x288] sm:$0xff]  ;;  %v214_v12 = vld.sshfl [vmem:[#allocation1 + $0x20] sm:$0xff pattern:$0x73625140]  ;;  %v135_v14 = vld [vmem:[#allocation5 + $0x280] sm:$0xff] }
  0x3d   :  { %313 = vmatpush.msrb.mxu0 %v127_v36  ;;  %332 = vmatpush.msrb.mxu1 %v144_v37  ;;  %v217_v13 = vld.sshfl [vmem:[#allocation1 + $0x38] sm:$0xff pattern:$0x73625140]  ;;  %v215_v15 = vld.sshfl [vmem:[#allocation1 + $0x28] sm:$0xff pattern:$0x73625140] }
  0x3e   :  { %354 = vmatpush.msrb.mxu2 %v158_v38  ;;  %373 = vmatpush.msrb.mxu3 %v175_v39 }
  0x3f   :  { %314 = vmatpush.msrb.mxu0 %v126_v40  ;;  %333 = vmatpush.msrb.mxu1 %v143_v41 }
  0x40   :  { %355 = vmatpush.msrb.mxu2 %v157_v42  ;;  %374 = vmatpush.msrb.mxu3 %v174_v43 }
  0x41   :  { %315 = vmatpush.msrb.mxu0 %v125_v44  ;;  %334 = vmatpush.msrb.mxu1 %v142_v45 }
  0x42   :  { %356 = vmatpush.msrb.mxu2 %v156_v46  ;;  %375 = vmatpush.msrb.mxu3 %v173_v47 }
  0x43   :  { %316 = vmatpush.msrb.mxu0 %v124_v48  ;;  %335 = vmatpush.msrb.mxu1 %v141_v49 }
  0x44   :  { %357 = vmatpush.msrb.mxu2 %v155_v50  ;;  %376 = vmatpush.msrb.mxu3 %v172_v51 }
  0x45   :  { %282 = vmatmul.f32.vlgmr.msra.gmra.mxu2 %v212_v52  ;;  %317 = vmatpush.msrb.mxu0 %v123_v53 }
  0x46   :  { %336 = vmatpush.msrb.mxu1 %v140_v54  ;;  %358 = vmatpush.msrb.mxu2 %v154_v55 }
  0x47   :  { %377 = vmatpush.msrb.mxu3 %v171_v56  ;;  %242 = vmatmul.f32.vlgmr.msra.gmra.mxu0 %v210_v57 }
  0x48   :  { %302 = vmatmul.f32.vlgmr.msra.gmra.mxu3 %v213_v58  ;;  %318 = vmatpush.msrb.mxu0 %v122_v59 }
  0x49   :  { %337 = vmatpush.msrb.mxu1 %v139_v60  ;;  %359 = vmatpush.msrb.mxu2 %v153_v61 }
  0x4a   :  { %378 = vmatpush.msrb.mxu3 %v170_v62  ;;  %262 = vmatmul.f32.vlgmr.msra.gmra.mxu1 %v211_v63 }
  0x4b   :  { %319 = vmatpush.msrb.mxu0 %v121_v0  ;;  %338 = vmatpush.msrb.mxu1 %v138_v1 }
  0x4c   :  { %360 = vmatpush.msrb.mxu2 %v152_v2  ;;  %379 = vmatpush.msrb.mxu3 %v169_v3 }
  0x4d   :  { %320 = vmatpush.msrb.mxu0 %v120_v4  ;;  %339 = vmatpush.msrb.mxu1 %v137_v5 }
  0x4e   :  { %361 = vmatpush.msrb.mxu2 %v151_v6  ;;  %380 = vmatpush.msrb.mxu3 %v168_v7 }
  0x4f   :  { %362 = vmatmul.f32.vlgmr.msrb.gmra.mxu2 %v216_v8  ;;  %321 = vmatpush.msrb.mxu0 %v119_v9 }
  0x50   :  { %340 = vmatpush.msrb.mxu1 %v136_v10  ;;  %381 = vmatpush.msrb.mxu3 %v167_v11 }
  0x51   :  { %322 = vmatmul.f32.vlgmr.msrb.gmra.mxu0 %v214_v12  ;;  %382 = vmatmul.f32.vlgmr.msrb.gmra.mxu3 %v217_v13 }
  0x52   :  { %341 = vmatpush.msrb.mxu1 %v135_v14 }
  0x53   :  { %342 = vmatmul.f32.vlgmr.msrb.gmra.mxu1 %v215_v15 }
  0xc4   :  { %v243_v17 = vpop.f32.mrf.mxu0 }
  0xc5   :  { %v244_v18 = vadd.f32 %v416_v16, %v243_v17 }
  0xc7   :  { %v263_v19 = vpop.f32.mrf.mxu1 }
  0xc8   :  { %v264_v20 = vadd.f32 %v263_v19, %v244_v18  ;;  %v283_v21 = vpop.f32.mrf.mxu2 }
  0xca   :  { %v284_v22 = vadd.f32 %v283_v21, %v264_v20 }
  0xcb   :  { %v303_v23 = vpop.f32.mrf.mxu3 }
  0xcc   :  { %v304_v24 = vadd.f32 %v303_v23, %v284_v22 }
  0xce   :  { %v323_v25 = vpop.f32.mrf.mxu0 }
  0xcf   :  { %v324_v26 = vadd.f32 %v323_v25, %v304_v24 }
  0xd0   :  { %v343_v27 = vpop.f32.mrf.mxu1 }
  0xd1   :  { %v344_v28 = vadd.f32 %v343_v27, %v324_v26 }
  0xd2   :  { %v363_v29 = vpop.f32.mrf.mxu2 }
  0xd3   :  { %v364_v30 = vadd.f32 %v363_v29, %v344_v28 }
  0xd4   :  { %v383_v31 = vpop.f32.mrf.mxu3 }
  0xd5   :  { %v384_v32 = vadd.f32 %v383_v31, %v364_v30 }
  0xd7   :  { %386 = vst [vmem:[#allocation7] sm:$0xff] %v384_v32 }
  0xd8   :  { %390 = vsyncadd [#allocation4], 96  ;;  %s393_s27 = sshll.u32 %s539_s3, 4  ;;  %s501_s28 = smov [#allocation7]   ;;  %s394_s27 = int_to_ptr.hbm [resolvable:$true] %s393_s27 }
  0xd9   :  { %s391_s29 = sshll.u32 %s501_s28, 4  ;;  %s502_s30 = smov 32   ;;  %s392_s29 = int_to_ptr.vmem [resolvable:$true] %s391_s29 }
  0xda   :  { %s503_s4 = smov 2  }
  0xdb   :  { %399 = dma.vmem_to_hbm [thread:$0]  %s392_s29, 32, %s394_s27, [#allocation4], %s502_s30, %s502_s30, %s503_s4  }
  0xdc   :  { %493 = dma.done.wait [#allocation4], 128  }
  0xdd   :  { %494 = vsyncadd [#allocation4], 4294967168 }
  0xde   :  { %404 = vsyncpa [#allocation3], 1 }
  0xdf   :  { %405 = vsyncpa [#allocation6], 1 }
  0xe0   :  { %406 = vsyncpa [#allocation4], 1 }

</bundles_post_ra>
